<compile_context>
chip_gen: v7x
topology: tpu7x:2x2x1
jax: 0.10.0
libtpu: 0.0.40
codegen_flags: <defaults>
</compile_context>

<pallas_src>
import functools

import jax
import jax.numpy as jnp
from jax import lax
from jax.experimental import pallas as pl
from jax.experimental.pallas import tpu as pltpu


def _softloss_kernel(x_ref, t_ref, inter_ref, sin_ref, stg_ref, *,
                     total_spatial, blocks_per_part, needs_mask):
    # x_ref : (1, C, TS) logits block   (channels on sublanes, spatial on lanes)
    # t_ref : (1, 1, TS) integer label block
    # outputs: (1, 1, C, 1) accumulators, VMEM-resident across the spatial axis
    p_idx = pl.program_id(1)
    s_idx = pl.program_id(2)

    @pl.when(s_idx == 0)
    def _():
        inter_ref[...] = jnp.zeros_like(inter_ref)
        sin_ref[...] = jnp.zeros_like(sin_ref)
        stg_ref[...] = jnp.zeros_like(stg_ref)

    logits = x_ref[0].astype(jnp.float32)            # (C, TS)
    labels = t_ref[0].astype(jnp.int32)              # (1, TS)
    C, TS = logits.shape

    # Numerically stable softmax over the channel axis (sublanes).  The divide
    # only touches the (1, TS) row-sum; the (C, TS) normalization is a VPU mul.
    m = jnp.max(logits, axis=0, keepdims=True)       # (1, TS)
    e = jnp.exp(logits - m)                          # (C, TS)
    inv = 1.0 / jnp.sum(e, axis=0, keepdims=True)    # (1, TS)  single-row divide
    probs = e * inv                                  # (C, TS)

    # Fused one-hot: broadcast compare against a (C, 1) channel iota — no
    # materialized (C, TS) int iota, no float one-hot, no extra multiply.
    cls = lax.broadcasted_iota(jnp.int32, (C, 1), 0)  # (C, 1)
    onehot = labels == cls                            # (C, TS) bool (broadcast)

    if needs_mask:
        # Lane-validity mask for the padded tail of the spatial axis.
        lane = lax.broadcasted_iota(jnp.int32, (1, TS), 1)
        glob = (p_idx * blocks_per_part + s_idx) * TS + lane
        valid = glob < total_spatial                  # (1, TS) bool
        onehot = jnp.logical_and(onehot, valid)
        probs_for_sum = jnp.where(valid, probs, 0.0)
    else:
        probs_for_sum = probs

    # Per-(batch, class) partial reductions over this spatial tile.
    inter_ref[0, 0] += jnp.sum(jnp.where(onehot, probs, 0.0), axis=1, keepdims=True)
    sin_ref[0, 0] += jnp.sum(probs_for_sum, axis=1, keepdims=True)
    stg_ref[0, 0] += jnp.sum(onehot.astype(jnp.float32), axis=1, keepdims=True)


def _pick_spatial_tile(S, C, elem_bytes, target_bytes=2 * 1024 * 1024):
    """Lane-dense spatial tile sized so the logits block is ~target_bytes."""
    ts = (target_bytes // max(1, elem_bytes * C)) // 128 * 128
    ts = max(128, ts)
    ts = min(ts, pl.cdiv(S, 128) * 128)   # no point exceeding the padded extent
    return int(ts)


def soft_loss_pallas(logits, target, smooth=0.01):
    """SoftLoss forward.

    logits: (N, C, H, W) float logits (f32 or bf16; DMA'd in native dtype)
    target: (N, 1, H, W) integer class labels in [0, C)
    returns: scalar float32 loss
    """
    N, C, H, W = logits.shape
    assert target.shape == (N, 1, H, W), target.shape
    S = H * W

    x = logits.reshape(N, C, S)           # channels on sublanes, spatial on lanes
    t = target.reshape(N, 1, S)
    # Never ship int64 / float labels to the kernel (PyTorch One_Hot does .long()).
    if jnp.issubdtype(t.dtype, jnp.floating) or t.dtype.itemsize > 4:
        t = t.astype(jnp.int32)

    elem_bytes = jnp.dtype(x.dtype).itemsize
    TS = _pick_spatial_tile(S, C, elem_bytes)

    # v7x has 2 TensorCores: if there is no batch parallelism, split the
    # spatial axis into a second "parallel" grid dim (no-op on v5e/v6e).
    P = 2 if N == 1 else 1

    S_pad = pl.cdiv(S, P * TS) * (P * TS)
    needs_mask = S_pad != S
    if needs_mask:
        pad = S_pad - S
        if jnp.issubdtype(t.dtype, jnp.signedinteger):
            pad_label = -1                              # never matches a class
        else:
            pad_label = jnp.iinfo(t.dtype).max
        x = jnp.pad(x, ((0, 0), (0, 0), (0, pad)))
        t = jnp.pad(t, ((0, 0), (0, 0), (0, pad)), constant_values=pad_label)

    blocks_per_part = S_pad // (P * TS)
    grid = (N, P, blocks_per_part)

    kernel = functools.partial(
        _softloss_kernel,
        total_spatial=S,
        blocks_per_part=blocks_per_part,
        needs_mask=needs_mask,
    )

    out_shapes = tuple(jax.ShapeDtypeStruct((N, P, C, 1), jnp.float32) for _ in range(3))
    out_specs = tuple(
        pl.BlockSpec((1, 1, C, 1), lambda n, p, s: (n, p, 0, 0)) for _ in range(3)
    )

    label_bytes = jnp.dtype(t.dtype).itemsize
    cost = pl.CostEstimate(
        flops=6 * N * C * S,
        transcendentals=N * C * S,
        bytes_accessed=N * S * (elem_bytes * C + label_bytes) + 3 * N * C * 4,
    )

    inter, sin, stg = pl.pallas_call(
        kernel,
        out_shape=out_shapes,
        grid=grid,
        in_specs=[
            pl.BlockSpec((1, C, TS), lambda n, p, s: (n, 0, p * blocks_per_part + s)),
            pl.BlockSpec((1, 1, TS), lambda n, p, s: (n, 0, p * blocks_per_part + s)),
        ],
        out_specs=out_specs,
        compiler_params=pltpu.CompilerParams(
            dimension_semantics=("parallel", "parallel", "arbitrary"),
            vmem_limit_bytes=32 * 1024 * 1024,
        ),
        cost_estimate=cost,
    )(x, t)

    # Tiny O(N*C) finalization in plain JAX (sums the spatial-split parts).
    inter = jnp.sum(inter, axis=1).reshape(N, C) + smooth
    union = (jnp.sum(sin, axis=1) + jnp.sum(stg, axis=1)).reshape(N, C) + smooth
    score = jnp.sum(2.0 * inter / union)
    return 1.0 - score / (float(N) * float(C))


if __name__ == "__main__":
    key = jax.random.PRNGKey(0)

    def reference(lg, tg, smooth=0.01):
        n, c = lg.shape[0], lg.shape[1]
        probs = jax.nn.softmax(lg.astype(jnp.float32), axis=1).reshape(n, c, -1)
        onehot = (tg.reshape(n, 1, -1) == jnp.arange(c).reshape(1, c, 1)).astype(jnp.float32)
        inter = jnp.sum(probs * onehot, axis=2) + smooth
        union = jnp.sum(probs, axis=2) + jnp.sum(onehot, axis=2) + smooth
        return 1.0 - jnp.sum(2.0 * inter / union) / (float(n) * float(c))

    # Primary case: aligned spatial extent (S = 256, multiple of 128).
    N, C, H, W = 2, 4, 16, 16
    k1, k2, k3, k4 = jax.random.split(key, 4)
    logits = jax.random.normal(k1, (N, C, H, W), dtype=jnp.float32)
    target = jax.random.randint(k2, (N, 1, H, W), 0, C, dtype=jnp.int32)

    loss = jax.block_until_ready(soft_loss_pallas(logits, target))
    ref = reference(logits, target)
    assert loss.shape == (), loss.shape
    assert loss.dtype == jnp.float32, loss.dtype
    assert jnp.allclose(loss, ref, atol=1e-5, rtol=1e-5), (loss, ref)

    # Ragged case: N == 1 exercises the 2-way spatial split (v7x dual-TC path)
    # and H*W = 63 exercises padding + in-kernel validity masking.
    N2, C2, H2, W2 = 1, 5, 9, 7
    logits2 = jax.random.normal(k3, (N2, C2, H2, W2), dtype=jnp.float32)
    target2 = jax.random.randint(k4, (N2, 1, H2, W2), 0, C2, dtype=jnp.int32)
    loss2 = jax.block_until_ready(soft_loss_pallas(logits2, target2))
    ref2 = reference(logits2, target2)
    assert jnp.allclose(loss2, ref2, atol=1e-5, rtol=1e-5), (loss2, ref2)

    print("KERNEL_OK")
</pallas_src>

<mosaic_0001>
module attributes {stable_mosaic.version = 11 : i64} {
  func.func @_softloss_kernel(%arg0: i32, %arg1: i32, %arg2: i32, %arg3: memref<1x4x256xf32, #tpu.memory_space<vmem>>, %arg4: memref<1x1x256xi32, #tpu.memory_space<vmem>>, %arg5: memref<1x1x4x1xf32, #tpu.memory_space<vmem>>, %arg6: memref<1x1x4x1xf32, #tpu.memory_space<vmem>>, %arg7: memref<1x1x4x1xf32, #tpu.memory_space<vmem>>) attributes {dimension_semantics = [#tpu.dimension_semantics<parallel>, #tpu.dimension_semantics<parallel>, #tpu.dimension_semantics<arbitrary>], iteration_bounds = array<i64: 2, 1, 1>, scalar_prefetch = 0 : i64, scratch_operands = 0 : i64, tpu.core_type = #tpu.core_type<tc>, window_params = [{transform_indices = @transform_0, window_bounds = array<i64: 1, 4, 256>}, {transform_indices = @transform_1, window_bounds = array<i64: 1, 1, 256>}, {transform_indices = @transform_2, window_bounds = array<i64: 1, 1, 4, 1>}, {transform_indices = @transform_3, window_bounds = array<i64: 1, 1, 4, 1>}, {transform_indices = @transform_4, window_bounds = array<i64: 1, 1, 4, 1>}]} {
    %c0_i32 = arith.constant 0 : i32
    %0 = arith.cmpi eq, %arg2, %c0_i32 : i32
    %1 = arith.extui %0 : i1 to i32
    %c0_i32_0 = arith.constant 0 : i32
    %2 = arith.cmpi ne, %1, %c0_i32_0 : i32
    scf.if %2 {
      %cst_36 = arith.constant 0.000000e+00 : f32
      %50 = vector.broadcast %cst_36 : f32 to vector<1x1x4x1xf32>
      %c0_37 = arith.constant 0 : index
      %c0_38 = arith.constant 0 : index
      %c0_39 = arith.constant 0 : index
      %c0_40 = arith.constant 0 : index
      %51 = vector.load %arg5[%c0_37, %c0_38, %c0_39, %c0_40] : memref<1x1x4x1xf32, #tpu.memory_space<vmem>>, vector<1x1x4x1xf32>
      tpu.vector_store %arg5[%c0_37, %c0_38, %c0_39, %c0_40], %50 {strides = array<i32>} : memref<1x1x4x1xf32, #tpu.memory_space<vmem>>, vector<1x1x4x1xf32>,
      %cst_41 = arith.constant 0.000000e+00 : f32
      %52 = vector.broadcast %cst_41 : f32 to vector<1x1x4x1xf32>
      %c0_42 = arith.constant 0 : index
      %c0_43 = arith.constant 0 : index
      %c0_44 = arith.constant 0 : index
      %c0_45 = arith.constant 0 : index
      %53 = vector.load %arg6[%c0_42, %c0_43, %c0_44, %c0_45] : memref<1x1x4x1xf32, #tpu.memory_space<vmem>>, vector<1x1x4x1xf32>
      tpu.vector_store %arg6[%c0_42, %c0_43, %c0_44, %c0_45], %52 {strides = array<i32>} : memref<1x1x4x1xf32, #tpu.memory_space<vmem>>, vector<1x1x4x1xf32>,
      %cst_46 = arith.constant 0.000000e+00 : f32
      %54 = vector.broadcast %cst_46 : f32 to vector<1x1x4x1xf32>
      %c0_47 = arith.constant 0 : index
      %c0_48 = arith.constant 0 : index
      %c0_49 = arith.constant 0 : index
      %c0_50 = arith.constant 0 : index
      %55 = vector.load %arg7[%c0_47, %c0_48, %c0_49, %c0_50] : memref<1x1x4x1xf32, #tpu.memory_space<vmem>>, vector<1x1x4x1xf32>
      tpu.vector_store %arg7[%c0_47, %c0_48, %c0_49, %c0_50], %54 {strides = array<i32>} : memref<1x1x4x1xf32, #tpu.memory_space<vmem>>, vector<1x1x4x1xf32>,
    } else {
    }
    %c0 = arith.constant 0 : index
    %c0_1 = arith.constant 0 : index
    %c0_2 = arith.constant 0 : index
    %3 = vector.load %arg3[%c0, %c0_1, %c0_2] : memref<1x4x256xf32, #tpu.memory_space<vmem>>, vector<1x4x256xf32>
    %4 = vector.shape_cast %3 : vector<1x4x256xf32> to vector<4x256xf32>
    %c0_3 = arith.constant 0 : index
    %c0_4 = arith.constant 0 : index
    %c0_5 = arith.constant 0 : index
    %5 = vector.load %arg4[%c0_3, %c0_4, %c0_5] : memref<1x1x256xi32, #tpu.memory_space<vmem>>, vector<1x1x256xi32>
    %6 = vector.shape_cast %5 : vector<1x1x256xi32> to vector<1x256xi32>
    %cst = arith.constant dense<0xFF800000> : vector<256xf32>
    %7 = vector.multi_reduction <maximumf>, %4, %cst [0] : vector<4x256xf32> to vector<256xf32>
    %8 = vector.shape_cast %7 : vector<256xf32> to vector<1x256xf32>
    %9 = vector.broadcast %8 : vector<1x256xf32> to vector<4x256xf32>
    %10 = arith.subf %4, %9 : vector<4x256xf32>
    %11 = math.exp %10 : vector<4x256xf32>
    %cst_6 = arith.constant dense<0.000000e+00> : vector<256xf32>
    %12 = vector.multi_reduction <add>, %11, %cst_6 [0] : vector<4x256xf32> to vector<256xf32>
    %13 = vector.shape_cast %12 : vector<256xf32> to vector<1x256xf32>
    %cst_7 = arith.constant 1.000000e+00 : f32
    %14 = vector.broadcast %cst_7 : f32 to vector<1x256xf32>
    %15 = arith.divf %14, %13 : vector<1x256xf32>
    %16 = vector.broadcast %15 : vector<1x256xf32> to vector<4x256xf32>
    %17 = arith.mulf %11, %16 : vector<4x256xf32>
    %18 = tpu.iota {dimensions = array<i32: 0>} : vector<4x1xi32>
    %19 = vector.broadcast %6 : vector<1x256xi32> to vector<4x256xi32>
    %20 = vector.broadcast %18 : vector<4x1xi32> to vector<4x256xi32>
    %21 = arith.cmpi eq, %19, %20 : vector<4x256xi32>
    %c0_8 = arith.constant 0 : index
    %c0_9 = arith.constant 0 : index
    %c0_10 = arith.constant 0 : index
    %c0_11 = arith.constant 0 : index
    %22 = vector.load %arg5[%c0_8, %c0_9, %c0_10, %c0_11] : memref<1x1x4x1xf32, #tpu.memory_space<vmem>>, vector<1x1x4x1xf32>
    %23 = vector.shape_cast %22 : vector<1x1x4x1xf32> to vector<4x1xf32>
    %cst_12 = arith.constant 0.000000e+00 : f32
    %24 = vector.broadcast %cst_12 : f32 to vector<4x256xf32>
    %25 = arith.select %21, %17, %24 : vector<4x256xi1>, vector<4x256xf32>
    %cst_13 = arith.constant dense<0.000000e+00> : vector<4xf32>
    %26 = vector.multi_reduction <add>, %25, %cst_13 [1] : vector<4x256xf32> to vector<4xf32>
    %27 = vector.shape_cast %26 : vector<4xf32> to vector<4x1xf32>
    %28 = arith.addf %23, %27 : vector<4x1xf32>
    %c0_14 = arith.constant 0 : index
    %c0_15 = arith.constant 0 : index
    %c0_16 = arith.constant 0 : index
    %c0_17 = arith.constant 0 : index
    %29 = vector.load %arg5[%c0_14, %c0_15, %c0_16, %c0_17] : memref<1x1x4x1xf32, #tpu.memory_space<vmem>>, vector<1x1x4x1xf32>
    %30 = vector.shape_cast %29 : vector<1x1x4x1xf32> to vector<4x1xf32>
    %31 = vector.shape_cast %28 : vector<4x1xf32> to vector<1x1x4x1xf32>
    tpu.vector_store %arg5[%c0_14, %c0_15, %c0_16, %c0_17], %31 {strides = array<i32>} : memref<1x1x4x1xf32, #tpu.memory_space<vmem>>, vector<1x1x4x1xf32>,
    %c0_18 = arith.constant 0 : index
    %c0_19 = arith.constant 0 : index
    %c0_20 = arith.constant 0 : index
    %c0_21 = arith.constant 0 : index
    %32 = vector.load %arg6[%c0_18, %c0_19, %c0_20, %c0_21] : memref<1x1x4x1xf32, #tpu.memory_space<vmem>>, vector<1x1x4x1xf32>
    %33 = vector.shape_cast %32 : vector<1x1x4x1xf32> to vector<4x1xf32>
    %cst_22 = arith.constant dense<0.000000e+00> : vector<4xf32>
    %34 = vector.multi_reduction <add>, %17, %cst_22 [1] : vector<4x256xf32> to vector<4xf32>
    %35 = vector.shape_cast %34 : vector<4xf32> to vector<4x1xf32>
    %36 = arith.addf %33, %35 : vector<4x1xf32>
    %c0_23 = arith.constant 0 : index
    %c0_24 = arith.constant 0 : index
    %c0_25 = arith.constant 0 : index
    %c0_26 = arith.constant 0 : index
    %37 = vector.load %arg6[%c0_23, %c0_24, %c0_25, %c0_26] : memref<1x1x4x1xf32, #tpu.memory_space<vmem>>, vector<1x1x4x1xf32>
    %38 = vector.shape_cast %37 : vector<1x1x4x1xf32> to vector<4x1xf32>
    %39 = vector.shape_cast %36 : vector<4x1xf32> to vector<1x1x4x1xf32>
    tpu.vector_store %arg6[%c0_23, %c0_24, %c0_25, %c0_26], %39 {strides = array<i32>} : memref<1x1x4x1xf32, #tpu.memory_space<vmem>>, vector<1x1x4x1xf32>,
    %c0_27 = arith.constant 0 : index
    %c0_28 = arith.constant 0 : index
    %c0_29 = arith.constant 0 : index
    %c0_30 = arith.constant 0 : index
    %40 = vector.load %arg7[%c0_27, %c0_28, %c0_29, %c0_30] : memref<1x1x4x1xf32, #tpu.memory_space<vmem>>, vector<1x1x4x1xf32>
    %41 = vector.shape_cast %40 : vector<1x1x4x1xf32> to vector<4x1xf32>
    %42 = arith.extui %21 : vector<4x256xi1> to vector<4x256xi32>
    %43 = arith.sitofp %42 : vector<4x256xi32> to vector<4x256xf32>
    %cst_31 = arith.constant dense<0.000000e+00> : vector<4xf32>
    %44 = vector.multi_reduction <add>, %43, %cst_31 [1] : vector<4x256xf32> to vector<4xf32>
    %45 = vector.shape_cast %44 : vector<4xf32> to vector<4x1xf32>
    %46 = arith.addf %41, %45 : vector<4x1xf32>
    %c0_32 = arith.constant 0 : index
    %c0_33 = arith.constant 0 : index
    %c0_34 = arith.constant 0 : index
    %c0_35 = arith.constant 0 : index
    %47 = vector.load %arg7[%c0_32, %c0_33, %c0_34, %c0_35] : memref<1x1x4x1xf32, #tpu.memory_space<vmem>>, vector<1x1x4x1xf32>
    %48 = vector.shape_cast %47 : vector<1x1x4x1xf32> to vector<4x1xf32>
    %49 = vector.shape_cast %46 : vector<4x1xf32> to vector<1x1x4x1xf32>
    tpu.vector_store %arg7[%c0_32, %c0_33, %c0_34, %c0_35], %49 {strides = array<i32>} : memref<1x1x4x1xf32, #tpu.memory_space<vmem>>, vector<1x1x4x1xf32>,
    return
  }
  func.func @transform_0(%arg0: i32, %arg1: i32, %arg2: i32) -> (i32, i32, i32) {
    %c1_i32 = arith.constant 1 : i32
    %0 = arith.muli %arg1, %c1_i32 : i32
    %1 = arith.addi %0, %arg2 : i32
    %c0_i32 = arith.constant 0 : i32
    %c0_i32_0 = arith.constant 0 : i32
    return %arg0, %c0_i32, %1 : i32, i32, i32
  }
  func.func @transform_1(%arg0: i32, %arg1: i32, %arg2: i32) -> (i32, i32, i32) {
    %c1_i32 = arith.constant 1 : i32
    %0 = arith.muli %arg1, %c1_i32 : i32
    %1 = arith.addi %0, %arg2 : i32
    %c0_i32 = arith.constant 0 : i32
    %c0_i32_0 = arith.constant 0 : i32
    return %arg0, %c0_i32, %1 : i32, i32, i32
  }
  func.func @transform_2(%arg0: i32, %arg1: i32, %arg2: i32) -> (i32, i32, i32, i32) {
    %c0_i32 = arith.constant 0 : i32
    %c0_i32_0 = arith.constant 0 : i32
    %c0_i32_1 = arith.constant 0 : i32
    return %arg0, %arg1, %c0_i32, %c0_i32_0 : i32, i32, i32, i32
  }
  func.func @transform_3(%arg0: i32, %arg1: i32, %arg2: i32) -> (i32, i32, i32, i32) {
    %c0_i32 = arith.constant 0 : i32
    %c0_i32_0 = arith.constant 0 : i32
    %c0_i32_1 = arith.constant 0 : i32
    return %arg0, %arg1, %c0_i32, %c0_i32_0 : i32, i32, i32, i32
  }
  func.func @transform_4(%arg0: i32, %arg1: i32, %arg2: i32) -> (i32, i32, i32, i32) {
    %c0_i32 = arith.constant 0 : i32
    %c0_i32_0 = arith.constant 0 : i32
    %c0_i32_1 = arith.constant 0 : i32
    return %arg0, %arg1, %c0_i32, %c0_i32_0 : i32, i32, i32, i32
  }
}

</mosaic_0001>

<bundles_post_ra>
// kernel: tpu_custom_call.1
= control target key start
LH: loop header
LB: loop body
LE: loop exit
PB: predicated region body
PF: predicated region fallthrough
CT: control target
= control target key end

     0   :  { %10 = vsyncpa [#allocation3], 0  ;;  %s1091_s0 = inlined_call_operand.hbm [shape: f32[2,4,256], index: 0, kind: input, shape index: {}]   ;;  %s1092_s1 = inlined_call_operand.hbm [shape: s32[2,1,256], index: 1, kind: input, shape index: {}]   ;;  %s1093_s2 = inlined_call_operand.vmem [shape: f32[2,1,4,1], index: 2, kind: output, shape index: {0}]   ;;  %s1094_s3 = inlined_call_operand.vmem [shape: f32[2,1,4,1], index: 3, kind: output, shape index: {1}]   ;;  %s1095_s4 = inlined_call_operand.vmem [shape: f32[2,1,4,1], index: 4, kind: output, shape index: {2}]  }
   0x1   :  { %12 = vsyncpa [#allocation3 + $0x1], 0 }
   0x2   :  { %13 = vsyncpa [#allocation5], 0 }
   0x3   :  { %15 = vsyncpa [#allocation5 + $0x1], 0  ;;  %s874_s15 = smov 0   ;;  %s876_s16 = smov 0  }
   0x4   :  { %s878_s17 = smov 0   ;;  %s880_s18 = smov 0  }
   0x5   :  { %s882_s19 = smov 0   ;;  %s884_s20 = smov 0  }
   0x6 LB: > { %s640_s21 = sadd.s32 4294967295, %s844_s20   ;;  %s40_s22 = sadd.s32 1, %s840_s19  ;;  %s844_s20 = sphi %s884_s20, %s21_s20   ;;  %s840_s19 = sphi %s882_s19, %s1109_s19   ;;  %s836_s18 = sphi %s880_s18, %s1108_s18   ;;  %s832_s17 = sphi %s878_s17, %s1107_s17   ;;  %s828_s16 = sphi %s876_s16, %s1106_s16   ;;  %s824_s15 = sphi %s874_s15, %s1105_s15  }
   0x7   : > { %p42_p0 = scmp.ge.s32.totalorder %s40_s22, 2  ;;  %s51_s23 = sadd.s32 1, %s832_s17 }
   0x8   : > { %p58_p1 = scmp.ne.s32.totalorder %s832_s17, %s828_s16  ;;  %p59_p2 = scmp.eq.s32.totalorder %s844_s20, 0 }
   0x9   : > { %s1111_s22 = smov (%p42_p0, %s40_s22), 0  ;;  %p64_p4 = scmp.ne.s32.totalorder %s828_s16, %s824_s15 }
   0xa   : > { %p910_p3 = por %p59_p2, %p58_p1  ;;  %s46_s25 = ssub.s32 %s840_s19, %s1111_s22 }
   0xb   : > { %p65_p5 = scmp.eq.s32.totalorder %s640_s21, 0  ;;  %p49_p6 = scmp.eq.s32.totalorder %s46_s25, 0 }
   0xc   : > { %p673_p8 = scmp.lt.s32.totalorder %s844_s20, 2  ;;  %s926_s28 = sand.u32 1, %s832_s17  }
   0xd   : > { %p917_p7 = por %p65_p5, %p64_p4  ;;  %s660_s29 = sshll.u32 %s840_s19, 7 }
   0xe   : > { %s923_s27 = scalar_select %p49_p6, %s832_s17, %s51_s23  }
   0xf   : > { %s1098_s26 = scalar_select %p917_p7, 1, 0 }
  0x10   : > { %s644_s30 = sshll.u32 %s926_s28, 3  ;;  %s933_s7 = scalar_lea.hbm %s1091_s0, %s660_s29 }
  0x11   : > { %s206_s8 = scalar_lea.vmem [#allocation2], %s644_s30  ;;  %p937_p9 = pnand %p673_p8, %p910_p3 }
  0x12   : > { %s217_s9 = sshll.u32 %s206_s8, 4  ;;  %s203_s11 = scalar_lea.sflag [#allocation3], %s926_s28  ;;  %s941_s9 = int_to_ptr.vmem [resolvable:$true] %s217_s9 }
  0x13   : > { %s730_s12 = scalar_lea.hbm %s933_s7, 128  ;;  %p732_p13 = pneg %p937_p9 }
  0x14   : > { %p731_p12 = scmp.ne.s32.totalorder %s933_s7, %s730_s12  ;;  %s735_s15 = scalar_lea.hbm %s1091_s0, 256 }
  0x15   : > { %p736_p2 = scmp.lt.u32.totalorder %s933_s7, %s1091_s0  ;;  %p737_p3 = scmp.lt.u32.totalorder %s735_s15, %s730_s12 }
  0x16   : > { %p733_p0 = pnand %p732_p13, %p731_p12  ;;  %p739_p5 = scmp.lt.u32.totalorder %s730_s12, %s933_s7 }
  0x17   : > { %p738_p4 = por %p737_p3, %p736_p2 }
  0x18   : > { %p734_p1 = pneg %p733_p0 }
  0x19   : > { %p740_p6 = por %p739_p5, %p738_p4 }
  0x1b   : > { %p741_p8 = pnand %p740_p6, %p734_p1 }
  0x1d   : > { %744 = shalt.err (!%p741_p8)
}
  0x1e   : > { %s745_s24 = scalar_lea.vmem %s941_s9, 128  ;;  %s846_s25 = smov [#allocation2]  }
  0x1f   : > { %p746_p12 = scmp.ne.s32.totalorder %s941_s9, %s745_s24  ;;  %s750_s29 = sshll.u32 %s846_s25, 4  ;;  %s751_s29 = int_to_ptr.vmem [resolvable:$false] %s750_s29 }
  0x20   : > { %s752_s30 = scalar_lea.vmem %s751_s29, 256  ;;  %p753_p11 = scmp.lt.s32.totalorder %s941_s9, %s751_s29 }
  0x21   : > { %p748_p0 = pnand %p746_p12, %p732_p13  ;;  %p754_p2 = scmp.lt.s32.totalorder %s752_s30, %s745_s24 }
  0x23   : > { %p749_p10 = pneg %p748_p0  ;;  %p755_p3 = por %p754_p2, %p753_p11 }
  0x25   : > { %p756_p4 = pnand %p755_p3, %p749_p10 }
  0x27   : > { %759 = shalt.err (!%p756_p4)
}
  0x28   : > { %669 = dma.hbm_to_vmem [thread:$0]  (!%p937_p9), %s933_s7, 128, %s941_s9, %s203_s11  }
  0x29   : > { %p1100_p1 = scmp.lt.s32.totalorder %s844_s20, 3  ;;  %p1101_p5 = scmp.ge.s32.totalorder %s844_s20, 1 }
  0x2a   : > { %s647_s6 = sshll.u32 %s926_s28, 1  ;;  %s661_s8 = sshll.u32 %s840_s19, 5 }
  0x2b   : > { %p975_p6 = pnand %p1101_p5, %p1100_p1  ;;  %s984_s14 = scalar_lea.hbm %s1092_s1, %s661_s8 }
  0x2c   : > { %s228_s15 = scalar_lea.vmem [#allocation4], %s647_s6  ;;  %s225_s7 = scalar_lea.sflag [#allocation5], %s926_s28 }
  0x2d   : > { %s1102_s5 = scalar_select %p975_p6, 1, 0 }
  0x2e   : > { %s239_s21 = sshll.u32 %s228_s15, 4  ;;  %s760_s9 = scalar_lea.hbm %s984_s14, 32  ;;  %s240_s21 = int_to_ptr.vmem [resolvable:$true] %s239_s21 }
  0x2f   : > { %p761_p10 = scmp.ne.s32.totalorder %s984_s14, %s760_s9  ;;  %s765_s24 = scalar_lea.hbm %s1092_s1, 64 }
  0x30   : > { %p766_p12 = scmp.lt.u32.totalorder %s984_s14, %s1092_s1  ;;  %p767_p0 = scmp.lt.u32.totalorder %s765_s24, %s760_s9 }
  0x31   : > { %p763_p11 = pnand %p761_p10, %p732_p13  ;;  %p769_p3 = scmp.lt.u32.totalorder %s760_s9, %s984_s14 }
  0x32   : > { %p768_p2 = por %p767_p0, %p766_p12 }
  0x33   : > { %p764_p8 = pneg %p763_p11 }
  0x34   : > { %p770_p4 = por %p769_p3, %p768_p2 }
  0x36   : > { %p771_p1 = pnand %p770_p4, %p764_p8 }
  0x38   : > { %774 = shalt.err (!%p771_p1)
}
  0x39   : > { %s775_s28 = scalar_lea.vmem %s240_s21, 32  ;;  %s847_s30 = smov [#allocation4]  }
  0x3a   : > { %p776_p5 = scmp.ne.s32.totalorder %s240_s21, %s775_s28  ;;  %s780_s6 = sshll.u32 %s847_s30, 4  ;;  %s781_s6 = int_to_ptr.vmem [resolvable:$false] %s780_s6 }
  0x3b   : > { %s782_s8 = scalar_lea.vmem %s781_s6, 64  ;;  %p783_p7 = scmp.lt.s32.totalorder %s240_s21, %s781_s6 }
  0x3c   : > { %p778_p10 = pnand %p776_p5, %p732_p13  ;;  %p784_p6 = scmp.lt.s32.totalorder %s782_s8, %s775_s28 }
  0x3e   : > { %p779_p11 = pneg %p778_p10  ;;  %p785_p0 = por %p784_p6, %p783_p7 }
  0x40   : > { %p786_p12 = pnand %p785_p0, %p779_p11 }
  0x42   : > { %789 = shalt.err (!%p786_p12)
}
  0x43   : > { %672 = dma.hbm_to_vmem [thread:$0]  (!%p937_p9), %s984_s14, 32, %s240_s21, %s225_s7  }
  0x44   : > { %p1103_p8 = scmp.ne.s32.totalorder %s1102_s5, 0 }
  0x45   : > { %s250_s12 = sand.u32 (!%p1103_p8), 1, %s828_s16   ;;  %p1104_p13 = scmp.ne.s32.totalorder (!%p1103_p8), %s1098_s26, 0 }
  0x46   : > { %248 = sbr.rel (%p1103_p8) target bundleno = 299 (0x12b), region = 28  ;;  %s651_s13 = sshll.u32 (!%p1103_p8), %s250_s12, 3 }
  0x47   : > { %s251_s15 = scalar_lea.sflag (!%p1103_p8), [#allocation3], %s250_s12  ;;  %s254_s9 = scalar_lea.vmem (!%p1103_p8), [#allocation2], %s651_s13 }
  0x4d   : > { %815 = dma.done.wait (%p1104_p13), %s251_s15, 128  }
  0x4e   : > { %817 = vsyncadd (%p1104_p13), %s251_s15, 4294967168  ;;  %s652_s11 = sshll.u32 %s250_s12, 1  ;;  %s260_s23 = scalar_lea.sflag [#allocation5], %s250_s12 }
  0x4f   : > { %s263_s10 = scalar_lea.vmem [#allocation4], %s652_s11 }
  0x50   : > { %819 = dma.done.wait (%p1104_p13), %s260_s23, 32  }
  0x51   : > { %821 = vsyncadd (%p1104_p13), %s260_s23, 4294967264  ;;  %v395_v0 = vlaneseq  ;;  %p313_p7 = scmp.lt.s32.totalorder %s836_s18, 1  ;;  %vm338_vm0 = vcmask 3072   ;;  %vm347_vm1 = vcmask 1043456   ;;  %v848_v4 = vmov 0.0   ;;  %v342_v5 = vld [vmem:[%s254_s9] sm:$0xff] }
  0x52   : > { %v343_v6 = vld [vmem:[%s263_s10] sm:$0x3]  ;;  %v345_v7 = vcombine.high %v342_v5, %v342_v5  ;;  %v348_v8 = vsel %vm347_vm1, %v342_v5, -inf }
  0x53   : > { %v1018_v1 = vshrl.u32 %v395_v0, 7  ;;  %s1113_s18 = smov (!%p313_p7, %s836_s18), 1  ;;  %v349_v11 = vrot.slane %v348_v8, 4 }
  0x54   : > { %s1023_s5 = sshll.u32 %s1113_s18, 2  ;;  %v355_v12 = vsel %vm347_vm1, %v345_v7, -inf }
  0x55   : > { %v399_v2 = vsub.s32 0, %v1018_v1  ;;  %v403_v3 = vsub.s32 1, %v1018_v1  ;;  %s1029_s26 = scalar_lea.vmem %s1093_s2, %s1023_s5  ;;  %v350_v13 = vmax.f32 %v348_v8, %v349_v11  ;;  %v356_v14 = vrot.slane %v355_v12, 4  ;;  %s333_s24 = scalar_lea.vmem %s1095_s4, %s1023_s5 }
  0x56   : > { %339 = vst.msk [vmem:[%s1029_s26] sm:$0xf] %vm338_vm0, %v848_v4  ;;  %s326_s28 = scalar_lea.vmem %s1094_s3, %s1023_s5  ;;  %341 = vst.msk [vmem:[%s333_s24] sm:$0xf] %vm338_vm0, %v848_v4 }
  0x57   : > { %v400_v9 = vrot.slane %v343_v6, %v399_v2  ;;  %v404_v10 = vrot.slane %v343_v6, %v403_v3  ;;  %v351_v19 = vrot.slane %v350_v13, 2  ;;  %v357_v20 = vmax.f32 %v355_v12, %v356_v14  ;;  %340 = vst.msk [vmem:[%s326_s28] sm:$0xf] %vm338_vm0, %v848_v4 }
  0x59   : > { %vm405_vm2 = vcmp.eq.s32.totalorder %v400_v9, %v1018_v1  ;;  %vm406_vm3 = vcmp.eq.s32.totalorder %v404_v10, %v1018_v1  ;;  %v352_v22 = vmax.f32 %v350_v13, %v351_v19  ;;  %v358_v23 = vrot.slane %v357_v20, 2 }
  0x5a   : > { %v656_v15 = vsel %vm405_vm2, 1.0, %v848_v4  ;;  %v657_v16 = vsel %vm406_vm3, 1.0, %v848_v4 }
  0x5b   : > { %v434_v17 = vsel %vm347_vm1, %v656_v15, 0.0  ;;  %v435_v18 = vsel %vm347_vm1, %v657_v16, 0.0  ;;  %v353_v24 = vrot.slane %v352_v22, 1  ;;  %v359_v25 = vmax.f32 %v357_v20, %v358_v23 }
  0x5c   : > { %v436_v21 = vadd.f32 %v435_v18, %v434_v17 }
  0x5d   : > { %v354_v26 = vmax.f32 %v352_v22, %v353_v24  ;;  %v360_v27 = vrot.slane %v359_v25, 1  ;;  %v429_v61 = vld [vmem:[%s333_s24] sm:$0xf] }
  0x5e   : > { %437 = vadd.xlane.f32.xlu1 %v436_v21  ;;  %v407_v0 = vld [vmem:[%s1029_s26] sm:$0xf] }
  0x5f   : > { %v361_v28 = vmax.f32 %v359_v25, %v360_v27  ;;  %v421_v3 = vld [vmem:[%s326_s28] sm:$0xf] }
  0x61   : > { %v364_v29 = vcombine.low %v354_v26, %v361_v28 }
  0x63   : > { %v366_v30 = vsub.f32 %v342_v5, %v364_v29 }
  0x65   : > { %v367_v31 = vmul.f32 1.442695, %v366_v30 }
  0x67   : > { %724 = vpow2.f32 %v367_v31 }
  0x71   : > { %v725_v32 = vpop.eup %724 }
  0x72   : > { %v370_v33 = vcombine.high %v725_v32, %v725_v32  ;;  %v372_v34 = vsel %vm347_vm1, %v725_v32, 0.0 }
  0x73   : > { %v373_v35 = vrot.slane %v372_v34, 4 }
  0x74   : > { %v379_v36 = vsel %vm347_vm1, %v370_v33, 0.0 }
  0x75   : > { %v374_v37 = vadd.f32 %v373_v35, %v372_v34  ;;  %v380_v38 = vrot.slane %v379_v36, 4 }
  0x77   : > { %v375_v39 = vrot.slane %v374_v37, 2  ;;  %v381_v40 = vadd.f32 %v380_v38, %v379_v36 }
  0x79   : > { %v376_v41 = vadd.f32 %v375_v39, %v374_v37  ;;  %v382_v42 = vrot.slane %v381_v40, 2 }
  0x7b   : > { %v377_v43 = vrot.slane %v376_v41, 1  ;;  %v383_v44 = vadd.f32 %v382_v42, %v381_v40 }
  0x7d   : > { %v378_v45 = vadd.f32 %v377_v43, %v376_v41  ;;  %v384_v46 = vrot.slane %v383_v44, 1 }
  0x7f   : > { %v385_v47 = vadd.f32 %v384_v46, %v383_v44  ;;  %726 = vrcp.f32 %v378_v45 }
  0x81   : > { %728 = vrcp.f32 %v385_v47 }
  0x89   : > { %v727_v48 = vpop.eup %726 }
  0x8b   : > { %v729_v49 = vpop.eup %728 }
  0x8c   : > { %v392_v50 = vcombine.low %v727_v48, %v729_v49 }
  0x8e   : > { %v394_v51 = vmul.f32 %v725_v32, %v392_v50 }
  0x90   : > { %v409_v52 = vcombine.high %v394_v51, %v394_v51  ;;  %v411_v53 = vsel %vm405_vm2, %v394_v51, 0.0  ;;  %v422_v57 = vsel %vm347_vm1, %v394_v51, 0.0 }
  0x91   : > { %v413_v54 = vsel %vm347_vm1, %v411_v53, 0.0 }
  0x92   : > { %v412_v55 = vsel %vm406_vm3, %v409_v52, 0.0  ;;  %v423_v58 = vsel %vm347_vm1, %v409_v52, 0.0 }
  0x93   : > { %v414_v56 = vsel %vm347_vm1, %v412_v55, 0.0  ;;  %v424_v60 = vadd.f32 %v423_v58, %v422_v57 }
  0x94   : > { %v415_v59 = vadd.f32 %v414_v56, %v413_v54 }
  0x96   : > { %416 = vadd.xlane.f32.xlu0 %v415_v59 }
  0x9a   : > { %425 = vadd.xlane.f32.xlu0 %v424_v60 }
  0xeb   : > { %v438_v62 = vpop.xlane.xlu1 %437 }
  0xec   : > { %v439_v63 = vadd.f32 %v438_v62, %v429_v61 }
  0xee   : > { %440 = vst.msk [vmem:[%s333_s24] sm:$0xf] %vm338_vm0, %v439_v63 }
 0x123   : > { %v417_v1 = vpop.xlane.xlu0 %416 }
 0x124   : > { %v418_v2 = vadd.f32 %v417_v1, %v407_v0 }
 0x126   : > { %420 = vst.msk [vmem:[%s1029_s26] sm:$0xf] %vm338_vm0, %v418_v2 }
 0x127   : > { %v426_v5 = vpop.xlane.xlu0 %425 }
 0x128   : > { %v427_v6 = vadd.f32 %v426_v5, %v421_v3 }
 0x12a   : > { %428 = vst.msk [vmem:[%s326_s28] sm:$0xf] %vm338_vm0, %v427_v6 }
 0x12b PF: > { %s21_s20 = sadd.s32 1, %s844_s20   ;;  %s1105_s15 = smov %s828_s16 }
 0x12c   : > { %p18_p9 = scmp.ge.s32.totalorder %s21_s20, 4   ;;  %s1106_s16 = smov %s832_s17 }
 0x12d   : > { %s1107_s17 = smov %s923_s27  ;;  %s1108_s18 = smov %s840_s19 }
 0x12e   : > { %s1109_s19 = smov %s1111_s22  ;;  %20 = sbr.rel (!%p18_p9) target bundleno = 6 (0x6), region = 109 }
 0x135   :  { %506 = vsyncpa [#allocation3], 1 }
 0x136   :  { %508 = vsyncpa [#allocation3 + $0x1], 1 }
 0x137   :  { %509 = vsyncpa [#allocation5], 1 }
 0x138   :  { %511 = vsyncpa [#allocation5 + $0x1], 1 }

</bundles_post_ra>
